<compile_context>
chip_gen: v6e
topology: v6e:2x2x1
jax: 0.10.0
libtpu: 0.0.40
codegen_flags: <defaults>
</compile_context>

<pallas_src>
import functools
import math

import jax
import jax.numpy as jnp
from jax.experimental import pallas as pl
from jax.experimental.pallas import tpu as pltpu


_EPS = 1e-12  # F.normalize(p=2, dim=1) eps


def _round_up(v, m):
    return (v + m - 1) // m * m


# ---------------------------------------------------------------------------
# Kernel 1: per-row inverse L2 norm  inv[i] = 1 / max(||v[i]||_2, eps)
# ---------------------------------------------------------------------------
def _inv_norm_kernel(v_ref, o_ref):
    v = v_ref[...].astype(jnp.float32)
    ssq = jnp.sum(v * v, axis=-1, keepdims=True)              # (tr, 1)
    o_ref[...] = 1.0 / jnp.maximum(jnp.sqrt(ssq), jnp.float32(_EPS))


def _row_inv_norms(v, row_tile):
    rows, feat = v.shape        # already padded: rows % row_tile == 0, feat % 128 == 0
    return pl.pallas_call(
        _inv_norm_kernel,
        out_shape=jax.ShapeDtypeStruct((rows, 1), jnp.float32),
        grid_spec=pltpu.PrefetchScalarGridSpec(
            num_scalar_prefetch=0,
            grid=(rows // row_tile,),
            in_specs=[pl.BlockSpec((row_tile, feat), lambda i: (i, 0))],
            out_specs=pl.BlockSpec((row_tile, 1), lambda i: (i, 0)),
        ),
        compiler_params=pltpu.CompilerParams(
            dimension_semantics=("parallel",)),
    )(v)


# ---------------------------------------------------------------------------
# Kernel 2: tiled cosine-logits matmul with f32 accumulator
# ---------------------------------------------------------------------------
def _cosine_matmul_kernel(x_ref, w_ref, xinv_ref, winv_ref, o_ref, acc_ref,
                          *, compute_dtype):
    k = pl.program_id(2)

    @pl.when(k == 0)
    def _():
        acc_ref[...] = jnp.zeros_like(acc_ref)

    # Normalize the W tile rows with the precomputed full-row inverse norms
    # (exact under K-tiling); x's row scale is applied once in the epilogue.
    w = w_ref[...].astype(jnp.float32) * winv_ref[...]          # (tn, tk)
    x = x_ref[...].astype(compute_dtype)
    # Contract last dims of both operands (== x @ w.T) — MXU-friendly,
    # no materialized transpose; accumulate in f32.
    acc_ref[...] += jax.lax.dot_general(
        x, w.astype(compute_dtype),
        dimension_numbers=(((1,), (1,)), ((), ())),
        preferred_element_type=jnp.float32)

    @pl.when(k == pl.num_programs(2) - 1)
    def _():
        o_ref[...] = (acc_ref[...] * xinv_ref[...]).astype(o_ref.dtype)


def adacos_logits(x, W, *, compute_dtype=jnp.bfloat16,
                  tm=256, tn=512, tk=512):
    """Cosine logits: normalize(x) @ normalize(W).T via a tiled Pallas matmul."""
    B, F = x.shape
    C, F2 = W.shape
    assert F == F2

    # Shrink tiles for small problems while keeping TPU-friendly granularity
    # (sublane dims multiples of 8, lane dims multiples of 128 -> lane-dense
    # unmasked stores on the output).
    tm = min(tm, _round_up(B, 8))
    tn = min(tn, _round_up(C, 128))
    tk = min(tk, _round_up(F, 128))

    Bp, Cp, Fp = _round_up(B, tm), _round_up(C, tn), _round_up(F, tk)
    xp = x if (Bp, Fp) == (B, F) else jnp.pad(x, ((0, Bp - B), (0, Fp - F)))
    Wp = W if (Cp, Fp) == (C, F) else jnp.pad(W, ((0, Cp - C), (0, Fp - F)))

    # Tiny per-row inverse-norm passes (zero pad rows are harmless: 0 * big = 0).
    x_inv = _row_inv_norms(xp, tm)        # (Bp, 1) f32
    w_inv = _row_inv_norms(Wp, tn)        # (Cp, 1) f32

    grid = (Bp // tm, Cp // tn, Fp // tk)
    itemsize = jnp.dtype(compute_dtype).itemsize
    cost = pl.CostEstimate(
        flops=2 * Bp * Cp * Fp,
        transcendentals=0,
        bytes_accessed=(Bp * Fp + Cp * Fp) * itemsize + Bp * Cp * 4)

    kernel = functools.partial(_cosine_matmul_kernel,
                               compute_dtype=compute_dtype)
    logits = pl.pallas_call(
        kernel,
        out_shape=jax.ShapeDtypeStruct((Bp, Cp), jnp.float32),
        grid_spec=pltpu.PrefetchScalarGridSpec(
            num_scalar_prefetch=0,
            grid=grid,
            in_specs=[
                pl.BlockSpec((tm, tk), lambda i, j, k: (i, k)),   # x tile
                pl.BlockSpec((tn, tk), lambda i, j, k: (j, k)),   # W tile
                pl.BlockSpec((tm, 1), lambda i, j, k: (i, 0)),    # 1/||x_row||
                pl.BlockSpec((tn, 1), lambda i, j, k: (j, 0)),    # 1/||w_row||
            ],
            out_specs=pl.BlockSpec((tm, tn), lambda i, j, k: (i, j)),
            scratch_shapes=[pltpu.VMEM((tm, tn), jnp.float32)],
        ),
        compiler_params=pltpu.CompilerParams(
            dimension_semantics=("parallel", "parallel", "arbitrary")),
        cost_estimate=cost,
    )(xp, Wp, x_inv, w_inv)

    if (Bp, Cp) != (B, C):
        logits = logits[:B, :C]
    return logits


def adacos_forward(x, W, s, m=0.5, label=None, *, compute_dtype=jnp.bfloat16):
    """Mirrors AdaCos.forward. Returns logits if label is None, otherwise
    (output, new_s) since the PyTorch module mutates self.s in-place."""
    # TODO(synk): margin `m` is accepted but unused, exactly like the reference.
    logits = adacos_logits(x, W, compute_dtype=compute_dtype)
    if label is None:
        return logits

    Bn, C = logits.shape
    theta = jnp.arccos(jnp.clip(logits, -1.0 + 1e-07, 1.0 - 1e-07))
    one_hot = jax.nn.one_hot(label, C, dtype=logits.dtype)

    B_avg = jnp.sum(jnp.where(one_hot < 1.0,
                              jnp.exp(s * logits),
                              jnp.zeros_like(logits))) / Bn
    theta_target = jnp.take_along_axis(
        theta, label.reshape(-1, 1).astype(jnp.int32), axis=1).reshape(-1)
    # torch.median returns the LOWER of the two middle values for even n.
    theta_med = jnp.sort(theta_target)[(Bn - 1) // 2]

    new_s = jnp.log(B_avg) / jnp.cos(jnp.minimum(jnp.float32(math.pi / 4),
                                                 theta_med))
    output = new_s * logits
    return output, new_s


def init_adacos_params(key, num_features, num_classes):
    # nn.init.xavier_uniform_ on (num_classes, num_features)
    bound = math.sqrt(6.0 / (num_features + num_classes))
    W = jax.random.uniform(key, (num_classes, num_features),
                           dtype=jnp.float32, minval=-bound, maxval=bound)
    s0 = math.sqrt(2.0) * math.log(num_classes - 1)
    return W, jnp.float32(s0)


if __name__ == "__main__":
    key = jax.random.PRNGKey(0)
    k_x, k_w, k_lbl = jax.random.split(key, 3)

    batch = 16
    num_features = 384
    num_classes = 272   # deliberately not a multiple of the tile sizes

    x = jax.random.normal(k_x, (batch, num_features), dtype=jnp.float32)
    W, s = init_adacos_params(k_w, num_features, num_classes)
    label = jax.random.randint(k_lbl, (batch,), 0, num_classes)

    # Plain JAX reference.
    xr = x / jnp.maximum(jnp.linalg.norm(x, axis=-1, keepdims=True), 1e-12)
    wr = W / jnp.maximum(jnp.linalg.norm(W, axis=-1, keepdims=True), 1e-12)
    ref = xr @ wr.T

    # Exact f32 path, small tiles so the (B, C, K) grid really exercises
    # multi-tile accumulation + padding: grid = (2, 3, 3).
    logits_f32 = adacos_logits(x, W, compute_dtype=jnp.float32,
                               tm=8, tn=128, tk=128)
    logits_f32 = jax.block_until_ready(logits_f32)
    assert logits_f32.shape == (batch, num_classes)
    assert jnp.max(jnp.abs(logits_f32 - ref)) < 1e-5, "f32 logits mismatch"

    # bf16 MXU path (f32 accumulation) with the default production tiling.
    logits_bf16 = adacos_logits(x, W)
    logits_bf16 = jax.block_until_ready(logits_bf16)
    assert jnp.max(jnp.abs(logits_bf16 - ref)) < 1e-2, "bf16 logits mismatch"

    # Training path: adaptive-scale update + scaled output.
    output, new_s = adacos_forward(x, W, s, label=label)
    output = jax.block_until_ready(output)
    new_s = jax.block_until_ready(new_s)
    assert output.shape == (batch, num_classes)
    assert bool(jnp.isfinite(new_s))

    print("KERNEL_OK")
</pallas_src>

<mosaic_0001>
module attributes {stable_mosaic.version = 11 : i64} {
  func.func @_inv_norm_kernel(%arg0: i32, %arg1: memref<8x384xf32, #tpu.memory_space<vmem>>, %arg2: memref<8x1xf32, #tpu.memory_space<vmem>>) attributes {dimension_semantics = [#tpu.dimension_semantics<parallel>], iteration_bounds = array<i64: 2>, scalar_prefetch = 0 : i64, scratch_operands = 0 : i64, tpu.core_type = #tpu.core_type<tc>, window_params = [{transform_indices = @transform_0, window_bounds = array<i64: 8, 384>}, {transform_indices = @transform_1, window_bounds = array<i64: 8, 1>}]} {
    %c0 = arith.constant 0 : index
    %c0_0 = arith.constant 0 : index
    %0 = vector.load %arg1[%c0, %c0_0] : memref<8x384xf32, #tpu.memory_space<vmem>>, vector<8x384xf32>
    %1 = arith.mulf %0, %0 : vector<8x384xf32>
    %cst = arith.constant dense<0.000000e+00> : vector<8xf32>
    %2 = vector.multi_reduction <add>, %1, %cst [1] : vector<8x384xf32> to vector<8xf32>
    %3 = vector.shape_cast %2 : vector<8xf32> to vector<8x1xf32>
    %4 = math.sqrt %3 : vector<8x1xf32>
    %cst_1 = arith.constant 9.99999996E-13 : f32
    %5 = vector.broadcast %cst_1 : f32 to vector<8x1xf32>
    %6 = arith.maximumf %4, %5 : vector<8x1xf32>
    %cst_2 = arith.constant 1.000000e+00 : f32
    %7 = vector.broadcast %cst_2 : f32 to vector<8x1xf32>
    %8 = arith.divf %7, %6 : vector<8x1xf32>
    %c0_3 = arith.constant 0 : index
    %c0_4 = arith.constant 0 : index
    %9 = vector.load %arg2[%c0_3, %c0_4] : memref<8x1xf32, #tpu.memory_space<vmem>>, vector<8x1xf32>
    tpu.vector_store %arg2[%c0_3, %c0_4], %8 {strides = array<i32>} : memref<8x1xf32, #tpu.memory_space<vmem>>, vector<8x1xf32>,
    return
  }
  func.func @transform_0(%arg0: i32) -> (i32, i32) {
    %c0_i32 = arith.constant 0 : i32
    %c0_i32_0 = arith.constant 0 : i32
    return %arg0, %c0_i32 : i32, i32
  }
  func.func @transform_1(%arg0: i32) -> (i32, i32) {
    %c0_i32 = arith.constant 0 : i32
    %c0_i32_0 = arith.constant 0 : i32
    return %arg0, %c0_i32 : i32, i32
  }
}

</mosaic_0001>

<bundles_post_ra>
// kernel: tpu_custom_call.1
= control target key start
LH: loop header
LB: loop body
LE: loop exit
PB: predicated region body
PF: predicated region fallthrough
CT: control target
= control target key end

     0   :  { %6 = vsyncpa [#allocation3], 0  ;;  %s441_s0 = inlined_call_operand.hbm [shape: f32[16,384], index: 0, kind: input, shape index: {}]   ;;  %s442_s1 = inlined_call_operand.vmem [shape: f32[16,1], index: 1, kind: output, shape index: {}]  }
   0x1   :  { %8 = vsyncpa [#allocation3 + $0x1], 0  ;;  %s349_s6 = smov 0   ;;  %s351_s7 = smov 0  }
   0x2   :  { %s353_s8 = smov 0   ;;  %s355_s9 = smov 0  }
   0x3 LB: > { %s368_s10 = sadd.s32 4294967295, %s336_s9   ;;  %s371_s11 = sadd.s32 1, %s336_s9   ;;  %s336_s9 = sphi %s355_s9, %s451_s9   ;;  %s332_s8 = sphi %s353_s8, %s450_s8   ;;  %s328_s7 = sphi %s351_s7, %s449_s7   ;;  %s324_s6 = sphi %s349_s6, %s448_s6  }
   0x4   : > { %s18_s12 = ssub.s32 %s336_s9, %s371_s11  ;;  %s21_s13 = sadd.s32 1, %s332_s8 }
   0x5   : > { %p19_p0 = scmp.eq.s32.totalorder %s18_s12, 0  ;;  %p28_p1 = scmp.ne.s32.totalorder %s332_s8, %s328_s7 }
   0x6   : > { %p29_p2 = scmp.eq.s32.totalorder %s336_s9, 0  ;;  %p34_p3 = scmp.ne.s32.totalorder %s328_s7, %s324_s6 }
   0x7   : > { %s381_s14 = scalar_select %p19_p0, %s332_s8, %s21_s13  }
   0x8   : > { %p30_p4 = por %p29_p2, %p28_p1  ;;  %p35_p5 = scmp.eq.s32.totalorder %s368_s10, 0 }
   0x9   : > { %p237_p6 = scmp.lt.s32.totalorder %s336_s9, 2  ;;  %s84_s16 = sand.u32 1, %s332_s8  }
   0xa   : > { %p385_p7 = por %p35_p5, %p34_p3  ;;  %s228_s17 = smul.u32 24, %s84_s16 }
   0xb   : > { %s229_s18 = smul.u32 384, %s336_s9  ;;  %p391_p8 = pnand %p237_p6, %p30_p4 }
   0xc   : > { %s444_s15 = scalar_select %p385_p7, 1, 0 }
   0xd   : > { %s399_s22 = scalar_lea.hbm %s441_s0, %s229_s18  ;;  %s88_s23 = scalar_lea.vmem [#allocation2], %s228_s17 }
   0xe   : > { %s96_s24 = sshll.u32 %s88_s23, 4  ;;  %s85_s25 = scalar_lea.sflag [#allocation3], %s84_s16  ;;  %s97_s24 = int_to_ptr.vmem [resolvable:$true] %s96_s24 }
   0xf   : > { %s274_s26 = scalar_lea.hbm %s399_s22, 384  ;;  %p276_p11 = pneg %p391_p8 }
  0x10   : > { %p275_p10 = scmp.ne.s32.totalorder %s399_s22, %s274_s26  ;;  %s279_s29 = scalar_lea.hbm %s441_s0, 768 }
  0x11   : > { %p280_p0 = scmp.lt.s32.totalorder %s399_s22, %s441_s0  ;;  %p281_p1 = scmp.lt.s32.totalorder %s279_s29, %s274_s26 }
  0x12   : > { %p277_p12 = pnand %p276_p11, %p275_p10 }
  0x13   : > { %p282_p2 = por %p281_p1, %p280_p0 }
  0x14   : > { %p278_p13 = pneg %p277_p12 }
  0x16   : > { %p283_p3 = pnand %p282_p2, %p278_p13 }
  0x18   : > { %286 = shalt.err (!%p283_p3)
}
  0x19   : > { %s287_s3 = scalar_lea.vmem %s97_s24, 384  ;;  %s338_s4 = smov [#allocation2]  }
  0x1a   : > { %p288_p4 = scmp.ne.s32.totalorder %s97_s24, %s287_s3  ;;  %s292_s5 = sshll.u32 %s338_s4, 4  ;;  %s293_s5 = int_to_ptr.vmem [resolvable:$false] %s292_s5 }
  0x1b   : > { %s294_s6 = scalar_lea.vmem %s293_s5, 768  ;;  %p295_p10 = scmp.lt.s32.totalorder %s97_s24, %s293_s5 }
  0x1c   : > { %p290_p5 = pnand %p288_p4, %p276_p11  ;;  %p296_p12 = scmp.lt.s32.totalorder %s294_s6, %s287_s3 }
  0x1e   : > { %p291_p6 = pneg %p290_p5  ;;  %p297_p9 = por %p296_p12, %p295_p10 }
  0x20   : > { %p298_p7 = pnand %p297_p9, %p291_p6 }
  0x22   : > { %301 = shalt.err (!%p298_p7)
}
  0x23   : > { %236 = dma.hbm_to_vmem [thread:$0]  (!%p391_p8), %s399_s22, 384, %s97_s24, %s85_s25  }
  0x24   : > { %p101_p13 = scmp.lt.s32.totalorder %s336_s9, 3  ;;  %p446_p0 = scmp.ge.s32.totalorder %s336_s9, 1 }
  0x26   : > { %p102_p1 = pnand %p446_p0, %p101_p13 }
  0x27   : > { %s107_s12 = sand.u32 (!%p102_p1), 1, %s328_s7   ;;  %p447_p11 = scmp.ne.s32.totalorder (!%p102_p1), %s444_s15, 0 }
  0x28   : > { %105 = sbr.rel (%p102_p1) target bundleno = 226 (0xe2), region = 24  ;;  %s108_s16 = scalar_lea.sflag (!%p102_p1), [#allocation3], %s107_s12 }
  0x29   : > { %s230_s13 = smul.u32 (!%p102_p1), 24, %s107_s12 }
  0x2b   : > { %s111_s17 = scalar_lea.vmem (!%p102_p1), [#allocation2], %s230_s13 }
  0x2d   : > { %319 = dma.done.wait (%p447_p11), %s108_s16, 384  }
  0x2e   : > { %321 = vsyncadd (%p447_p11), %s108_s16, 4294966912  ;;  %v133_v0 = vld [vmem:[%s111_s17] sm:$0xff]  ;;  %v134_v1 = vld [vmem:[%s111_s17 + $0x8] sm:$0xff]  ;;  %p129_p7 = scmp.lt.s32.totalorder %s368_s10, 1  ;;  %vm153_vm2 = vcmask 7168  }
  0x2f   : > { %v135_v2 = vld [vmem:[%s111_s17 + $0x10] sm:$0xff]  ;;  %v136_v3 = vmul.f32 %v133_v0, %v133_v0  ;;  %v137_v4 = vmul.f32 %v134_v1, %v134_v1 }
  0x30   : > { %v138_v5 = vmul.f32 %v135_v2, %v135_v2  ;;  %s453_s10 = smov (!%p129_p7, %s368_s10), 1 }
  0x31   : > { %v139_v6 = vadd.f32 %v137_v4, %v136_v3  ;;  %s225_s9 = sshll.u32 %s453_s10, 3 }
  0x32   : > { %s132_s19 = scalar_lea.vmem %s442_s1, %s225_s9 }
  0x33   : > { %v140_v7 = vadd.f32 %v139_v6, %v138_v5 }
  0x35   : > { %141 = vadd.xlane.f32.xlu0 %v140_v7 }
  0xbe   : > { %v142_v8 = vpop.xlane.xlu0 %141 }
  0xbf   : > { %270 = vrsqrt.f32 %v142_v8  ;;  %vm145_vm0 = vcmp.eq.f32.partialorder %v142_v8, inf  ;;  %v148_v11 = vand.u32 2147483648, %v142_v8  ;;  %vm147_vm1 = vcmp.eq.f32.partialorder %v142_v8, 0.0 }
  0xcc   : > { %v271_v9 = vpop.eup %270 }
  0xcd   : > { %v144_v10 = vmul.f32 %v271_v9, %v142_v8 }
  0xcf   : > { %v146_v12 = vsel %vm145_vm0, %v142_v8, %v144_v10 }
  0xd0   : > { %v149_v13 = vsel %vm147_vm1, %v148_v11, %v146_v12 }
  0xd1   : > { %v150_v14 = vmax.f32 %v149_v13, 1e-12 }
  0xd3   : > { %272 = vrcp.f32 %v150_v14 }
  0xe0   : > { %v273_v15 = vpop.eup %272 }
  0xe1   : > { %154 = vst.msk [vmem:[%s132_s19] sm:$0xff] %vm153_vm2, %v273_v15 }
  0xe2 PF: > { %p11_p8 = scmp.ge.s32.totalorder %s371_s11, 4   ;;  %s448_s6 = smov %s328_s7 }
  0xe3   : > { %s449_s7 = smov %s332_s8  ;;  %s450_s8 = smov %s381_s14 }
  0xe4   : > { %s451_s9 = smov %s371_s11  ;;  %13 = sbr.rel (!%p11_p8) target bundleno = 3 (0x3), region = 64 }
  0xe9   :  { %174 = vsyncpa [#allocation3], 1 }
  0xea   :  { %176 = vsyncpa [#allocation3 + $0x1], 1 }

</bundles_post_ra>
